<compile_context>
chip_gen: v7x
topology: tpu7x:2x2x1
jax: 0.10.0
libtpu: 0.0.40
codegen_flags: <defaults>
</compile_context>

<pallas_src>
import functools

import jax
import jax.numpy as jnp
from jax.experimental import pallas as pl
from jax.experimental.pallas import tpu as pltpu

EPS = 1e-5
_MIB = 1024 * 1024


# ---------------------------------------------------------------------------
# Kernels
# ---------------------------------------------------------------------------
def _bn_epilogue(y, g_ref, beta_ref, o_ref, apply_relu):
    """Training-mode BN + affine (+ReLU) with folded per-feature scale/shift."""
    inv_n = 1.0 / y.shape[0]
    mean = jnp.sum(y, axis=0, keepdims=True) * inv_n                 # (1, tn)
    ex2 = jnp.sum(y * y, axis=0, keepdims=True) * inv_n              # (1, tn)
    var = jnp.maximum(ex2 - mean * mean, 0.0)                        # biased var
    scale = g_ref[...] * jax.lax.rsqrt(var + EPS)                    # EUP rsqrt
    shift = beta_ref[...] - mean * scale
    out = y * scale + shift                                          # one pass
    if apply_relu:
        out = jnp.maximum(out, 0.0)
    o_ref[...] = out.astype(o_ref.dtype)


def _linear_bn_kernel(x_ref, w_ref, g_ref, beta_ref, o_ref, *, apply_relu):
    """Single-shot: whole d_in reduction in one MXU pass + fused BN epilogue."""
    y = jnp.dot(x_ref[...], w_ref[...], preferred_element_type=jnp.float32)
    _bn_epilogue(y, g_ref, beta_ref, o_ref, apply_relu)


def _linear_bn_kernel_kloop(x_ref, w_ref, g_ref, beta_ref, o_ref, acc_ref, *,
                            apply_relu):
    """Fallback: K-tiled reduction with resident f32 accumulator."""
    k = pl.program_id(1)

    @pl.when(k == 0)
    def _():
        acc_ref[...] = jnp.zeros_like(acc_ref)

    acc_ref[...] += jnp.dot(x_ref[...], w_ref[...],
                            preferred_element_type=jnp.float32)

    @pl.when(k == pl.num_programs(1) - 1)
    def _():
        _bn_epilogue(acc_ref[...], g_ref, beta_ref, o_ref, apply_relu)


# ---------------------------------------------------------------------------
# Tiling / launch
# ---------------------------------------------------------------------------
def _vmem_capacity_bytes():
    try:
        return int(pltpu.get_tpu_info().vmem_capacity_bytes)
    except Exception:
        return 64 * _MIB   # conservative default: v7x per-TensorCore VMEM


def _pick_tile(dim, pref, granule=256):
    """Largest `granule`-multiple dividing `dim`, capped near `pref`.
    Uses a 256 granule (v6e/v7x MXU width), falling back to 128, then to the
    full dim for non-lane-aligned toy shapes."""
    g = granule if (dim % granule == 0 and pref >= granule) else 128
    if dim % g != 0:
        return dim
    t = max(min((pref // g) * g, dim), g)
    while dim % t != 0:
        t -= g
    return t


def _fused_layer(x, w, gamma, beta, *, apply_relu, out_dtype,
                 max_tn=None, max_tk=None):
    n, d_in = x.shape
    d_out = w.shape[1]
    xb = x.dtype.itemsize
    wb = w.dtype.itemsize
    ob = jnp.dtype(out_dtype).itemsize

    # ~3/4 of physical VMEM (=> ~96 MiB on v5e/v6e, ~48 MiB on v7x per core).
    budget = min((_vmem_capacity_bytes() * 3) // 4, 112 * _MIB)

    # Output tile: lane-dense, prefer >=512, but keep >=2 Dout tiles when
    # d_out allows so the "parallel" axis can shard across v7x's 2 TCs.
    tn_pref = max(256, d_out // 2) if d_out >= 512 else d_out
    if max_tn is not None:
        tn_pref = min(tn_pref, max_tn)
    tn = _pick_tile(d_out, tn_pref)

    def single_k_need(tn_):
        return (2 * n * d_in * xb          # x block (double-buffered)
                + 2 * d_in * tn_ * wb      # weight block
                + 2 * 2 * tn_ * 4          # gamma / beta
                + 2 * n * tn_ * ob)        # output block

    def multi_k_need(tn_, tk_):
        return (2 * n * tk_ * xb + 2 * tk_ * tn_ * wb + 2 * 2 * tn_ * 4
                + 2 * n * tn_ * ob + n * tn_ * 4)       # + f32 accumulator

    use_single_k = (max_tk is None) or (max_tk >= d_in)
    if use_single_k:
        while single_k_need(tn) > budget and tn > 128 and d_out % (tn // 2) == 0:
            tn //= 2
        use_single_k = single_k_need(tn) <= budget

    if use_single_k:
        grid = (d_out // tn,)
        vmem_need = single_k_need(tn)
        kernel = functools.partial(_linear_bn_kernel, apply_relu=apply_relu)
        grid_spec = pltpu.PrefetchScalarGridSpec(
            num_scalar_prefetch=0,
            grid=grid,
            in_specs=[
                pl.BlockSpec((n, d_in), lambda j: (0, 0)),    # x (fetched once)
                pl.BlockSpec((d_in, tn), lambda j: (0, j)),   # W
                pl.BlockSpec((1, tn), lambda j: (0, j)),      # gamma
                pl.BlockSpec((1, tn), lambda j: (0, j)),      # beta
            ],
            out_specs=pl.BlockSpec((n, tn), lambda j: (0, j)),
        )
        dim_sem = ("parallel",)
        x_reads = 1
    else:
        # Very large d_in (or forced): K-tiled reduction, tk >= 1024 preferred
        # to keep accumulator RMW traffic and grid-step overhead low.
        tk_pref = 1024 if max_tk is None else max_tk
        tk = _pick_tile(d_in, tk_pref)
        while multi_k_need(tn, tk) > budget and tn > 128 and d_out % (tn // 2) == 0:
            tn //= 2
        while multi_k_need(tn, tk) > budget and tk > 256 and d_in % (tk // 2) == 0:
            tk //= 2
        grid = (d_out // tn, d_in // tk)
        vmem_need = multi_k_need(tn, tk)
        kernel = functools.partial(_linear_bn_kernel_kloop, apply_relu=apply_relu)
        grid_spec = pltpu.PrefetchScalarGridSpec(
            num_scalar_prefetch=0,
            grid=grid,
            in_specs=[
                pl.BlockSpec((n, tk), lambda j, k: (0, k)),
                pl.BlockSpec((tk, tn), lambda j, k: (k, j)),
                pl.BlockSpec((1, tn), lambda j, k: (0, j)),
                pl.BlockSpec((1, tn), lambda j, k: (0, j)),
            ],
            out_specs=pl.BlockSpec((n, tn), lambda j, k: (0, j)),
            scratch_shapes=[pltpu.VMEM((n, tn), jnp.float32)],
        )
        dim_sem = ("parallel", "arbitrary")
        x_reads = d_out // tn            # x is re-streamed once per Dout tile

    vmem_limit = int(min(max(vmem_need + vmem_need // 4, 32 * _MIB), budget))

    cost = pl.CostEstimate(
        flops=2 * n * d_in * d_out + 8 * n * d_out,
        transcendentals=d_out,                      # rsqrt per output feature
        bytes_accessed=(x_reads * n * d_in * xb
                        + d_in * d_out * wb
                        + 2 * d_out * 4
                        + n * d_out * ob),
    )

    return pl.pallas_call(
        kernel,
        out_shape=jax.ShapeDtypeStruct((n, d_out), out_dtype),
        grid_spec=grid_spec,
        compiler_params=pltpu.CompilerParams(
            dimension_semantics=dim_sem,
            vmem_limit_bytes=vmem_limit,
        ),
        cost_estimate=cost,
    )(x, w, gamma, beta)


# ---------------------------------------------------------------------------
# Parameters / forward
# ---------------------------------------------------------------------------
def init_params(key, in_dim, hidden_dim, out_dim):
    """Mirror nn.Linear default init U(-1/sqrt(fan_in), 1/sqrt(fan_in)) for the
    weights (stored bf16, (in, out) layout => y = x @ W) and BatchNorm1d
    defaults gamma=1, beta=0 (f32). No bias: BN's mean-subtraction cancels it."""
    dims = [(in_dim, hidden_dim), (hidden_dim, hidden_dim), (hidden_dim, out_dim)]
    params = []
    for (din, dout) in dims:
        key, kw = jax.random.split(key)
        bound = 1.0 / float(din) ** 0.5
        wmat = jax.random.uniform(kw, (din, dout), jnp.float32,
                                  -bound, bound).astype(jnp.bfloat16)
        gamma = jnp.ones((1, dout), jnp.float32)
        beta = jnp.zeros((1, dout), jnp.float32)
        params.append((wmat, gamma, beta))
    return params


def projection_mlp_forward(x, params, *, max_tn=None, max_tk=None):
    # mirror `if len(x.size()) != 2: x = x.view(x.size(0), -1)`
    if x.ndim != 2:
        x = x.reshape(x.shape[0], -1)
    x = x.astype(jnp.bfloat16)                     # bf16 operands into the MXU
    (w1, g1, b1), (w2, g2, b2), (w3, g3, b3) = params
    x = _fused_layer(x, w1, g1, b1, apply_relu=True, out_dtype=jnp.bfloat16,
                     max_tn=max_tn, max_tk=max_tk)          # layer1
    x = _fused_layer(x, w2, g2, b2, apply_relu=True, out_dtype=jnp.bfloat16,
                     max_tn=max_tn, max_tk=max_tk)          # layer2
    x = _fused_layer(x, w3, g3, b3, apply_relu=False, out_dtype=jnp.float32,
                     max_tn=max_tn, max_tk=max_tk)          # layer3 (no ReLU)
    return x


def _reference_forward(x, params):
    """Pure-JAX reference using the same bf16-operand / f32-accumulate path."""
    if x.ndim != 2:
        x = x.reshape(x.shape[0], -1)
    h = x.astype(jnp.bfloat16)
    for i, (wmat, g, b) in enumerate(params):
        y = jnp.dot(h, wmat, preferred_element_type=jnp.float32)
        mean = jnp.mean(y, axis=0, keepdims=True)
        var = jnp.mean((y - mean) ** 2, axis=0, keepdims=True)
        out = (y - mean) * jax.lax.rsqrt(var + EPS) * g + b
        if i < 2:
            out = jnp.maximum(out, 0.0)
            h = out.astype(jnp.bfloat16)
        else:
            h = out
    return h


if __name__ == "__main__":
    key = jax.random.PRNGKey(0)
    k_in, k_params = jax.random.split(key)

    # Small but lane-dense shapes: in_dim = 4*8*8 = 256, hidden 256, out 128
    # (multiples of 128 -> unmasked lane-dense stores).
    batch, c, h, w = 8, 4, 8, 8
    in_dim, hidden_dim, out_dim = c * h * w, 256, 128

    x = jax.random.normal(k_in, (batch, c, h, w), jnp.float32)
    params = init_params(k_params, in_dim, hidden_dim, out_dim)

    ref = _reference_forward(x, params)

    # Default fast path: K axis collapsed (single MXU pass + fused epilogue).
    out = projection_mlp_forward(x, params)
    jax.block_until_ready(out)
    assert out.shape == (batch, out_dim), out.shape
    assert bool(jnp.all(jnp.isfinite(out)))
    assert bool(jnp.allclose(out, ref, rtol=5e-2, atol=5e-2)), (
        float(jnp.max(jnp.abs(out - ref))))

    # Forced fallback path: K-tiled accumulator + multiple Dout tiles (regime
    # used when a single-shot block would not fit VMEM).
    out_kloop = projection_mlp_forward(x, params, max_tn=128, max_tk=128)
    jax.block_until_ready(out_kloop)
    assert bool(jnp.allclose(out_kloop, ref, rtol=5e-2, atol=5e-2)), (
        float(jnp.max(jnp.abs(out_kloop - ref))))

    print("KERNEL_OK")
</pallas_src>

<mosaic_0001>
module attributes {stable_mosaic.version = 11 : i64} {
  func.func @_linear_bn_kernel(%arg0: i32, %arg1: memref<8x256xbf16, #tpu.memory_space<vmem>>, %arg2: memref<256x256xbf16, #tpu.memory_space<vmem>>, %arg3: memref<1x256xf32, #tpu.memory_space<vmem>>, %arg4: memref<1x256xf32, #tpu.memory_space<vmem>>, %arg5: memref<8x256xbf16, #tpu.memory_space<vmem>>) attributes {dimension_semantics = [#tpu.dimension_semantics<parallel>], iteration_bounds = array<i64: 1>, scalar_prefetch = 0 : i64, scratch_operands = 0 : i64, tpu.core_type = #tpu.core_type<tc>, window_params = [{pipeline_mode = #tpu.pipeline_mode<synchronous>, transform_indices = @transform_0, window_bounds = array<i64: 8, 256>}, {transform_indices = @transform_1, window_bounds = array<i64: 256, 256>}, {transform_indices = @transform_2, window_bounds = array<i64: 1, 256>}, {transform_indices = @transform_3, window_bounds = array<i64: 1, 256>}, {transform_indices = @transform_4, window_bounds = array<i64: 8, 256>}]} {
    %c0 = arith.constant 0 : index
    %c0_0 = arith.constant 0 : index
    %0 = vector.load %arg1[%c0, %c0_0] : memref<8x256xbf16, #tpu.memory_space<vmem>>, vector<8x256xbf16>
    %c0_1 = arith.constant 0 : index
    %c0_2 = arith.constant 0 : index
    %1 = vector.load %arg2[%c0_1, %c0_2] : memref<256x256xbf16, #tpu.memory_space<vmem>>, vector<256x256xbf16>
    %cst = arith.constant dense<0.000000e+00> : vector<8x256xf32>
    %2 = tpu.matmul %0, %1, %cst {dimension_numbers = #tpu.dot_dimension_numbers<[1], [0], [0], [1], [0, 0, 1, 1], [], []>} : vector<8x256xbf16>, vector<256x256xbf16>, vector<8x256xf32> -> vector<8x256xf32>
    %cst_3 = arith.constant dense<0.000000e+00> : vector<256xf32>
    %3 = vector.multi_reduction <add>, %2, %cst_3 [0] : vector<8x256xf32> to vector<256xf32>
    %4 = vector.shape_cast %3 : vector<256xf32> to vector<1x256xf32>
    %cst_4 = arith.constant 1.250000e-01 : f32
    %5 = vector.broadcast %cst_4 : f32 to vector<1x256xf32>
    %6 = arith.mulf %4, %5 : vector<1x256xf32>
    %7 = arith.mulf %2, %2 : vector<8x256xf32>
    %cst_5 = arith.constant dense<0.000000e+00> : vector<256xf32>
    %8 = vector.multi_reduction <add>, %7, %cst_5 [0] : vector<8x256xf32> to vector<256xf32>
    %9 = vector.shape_cast %8 : vector<256xf32> to vector<1x256xf32>
    %cst_6 = arith.constant 1.250000e-01 : f32
    %10 = vector.broadcast %cst_6 : f32 to vector<1x256xf32>
    %11 = arith.mulf %9, %10 : vector<1x256xf32>
    %12 = arith.mulf %6, %6 : vector<1x256xf32>
    %13 = arith.subf %11, %12 : vector<1x256xf32>
    %cst_7 = arith.constant 0.000000e+00 : f32
    %14 = vector.broadcast %cst_7 : f32 to vector<1x256xf32>
    %15 = arith.maximumf %13, %14 : vector<1x256xf32>
    %c0_8 = arith.constant 0 : index
    %c0_9 = arith.constant 0 : index
    %16 = vector.load %arg3[%c0_8, %c0_9] : memref<1x256xf32, #tpu.memory_space<vmem>>, vector<1x256xf32>
    %cst_10 = arith.constant 9.99999974E-6 : f32
    %17 = vector.broadcast %cst_10 : f32 to vector<1x256xf32>
    %18 = arith.addf %15, %17 : vector<1x256xf32>
    %19 = math.rsqrt %18 : vector<1x256xf32>
    %20 = arith.mulf %16, %19 : vector<1x256xf32>
    %c0_11 = arith.constant 0 : index
    %c0_12 = arith.constant 0 : index
    %21 = vector.load %arg4[%c0_11, %c0_12] : memref<1x256xf32, #tpu.memory_space<vmem>>, vector<1x256xf32>
    %22 = arith.mulf %6, %20 : vector<1x256xf32>
    %23 = arith.subf %21, %22 : vector<1x256xf32>
    %24 = vector.broadcast %20 : vector<1x256xf32> to vector<8x256xf32>
    %25 = arith.mulf %2, %24 : vector<8x256xf32>
    %26 = vector.broadcast %23 : vector<1x256xf32> to vector<8x256xf32>
    %27 = arith.addf %25, %26 : vector<8x256xf32>
    %cst_13 = arith.constant 0.000000e+00 : f32
    %28 = vector.broadcast %cst_13 : f32 to vector<8x256xf32>
    %29 = arith.maximumf %27, %28 : vector<8x256xf32>
    %30 = arith.truncf %29 : vector<8x256xf32> to vector<8x256xbf16>
    %c0_14 = arith.constant 0 : index
    %c0_15 = arith.constant 0 : index
    %31 = vector.load %arg5[%c0_14, %c0_15] : memref<8x256xbf16, #tpu.memory_space<vmem>>, vector<8x256xbf16>
    tpu.vector_store %arg5[%c0_14, %c0_15], %30 {strides = array<i32>} : memref<8x256xbf16, #tpu.memory_space<vmem>>, vector<8x256xbf16>,
    return
  }
  func.func @transform_0(%arg0: i32) -> (i32, i32) {
    %c0_i32 = arith.constant 0 : i32
    %c0_i32_0 = arith.constant 0 : i32
    %c0_i32_1 = arith.constant 0 : i32
    return %c0_i32, %c0_i32_0 : i32, i32
  }
  func.func @transform_1(%arg0: i32) -> (i32, i32) {
    %c0_i32 = arith.constant 0 : i32
    %c0_i32_0 = arith.constant 0 : i32
    return %c0_i32, %arg0 : i32, i32
  }
  func.func @transform_2(%arg0: i32) -> (i32, i32) {
    %c0_i32 = arith.constant 0 : i32
    %c0_i32_0 = arith.constant 0 : i32
    return %c0_i32, %arg0 : i32, i32
  }
  func.func @transform_3(%arg0: i32) -> (i32, i32) {
    %c0_i32 = arith.constant 0 : i32
    %c0_i32_0 = arith.constant 0 : i32
    return %c0_i32, %arg0 : i32, i32
  }
  func.func @transform_4(%arg0: i32) -> (i32, i32) {
    %c0_i32 = arith.constant 0 : i32
    %c0_i32_0 = arith.constant 0 : i32
    return %c0_i32, %arg0 : i32, i32
  }
}

</mosaic_0001>

<bundles_post_ra>
// kernel: tpu_custom_call.1
= control target key start
LH: loop header
LB: loop body
LE: loop exit
PB: predicated region body
PF: predicated region fallthrough
CT: control target
= control target key end

     0   :  { %9 = vsyncpa [#allocation3], 0  ;;  %s675_s0 = inlined_call_operand.hbm [shape: bf16[8,256], index: 0, kind: input, shape index: {}]   ;;  %s676_s1 = inlined_call_operand.hbm [shape: bf16[256,256], index: 1, kind: input, shape index: {}]   ;;  %s677_s2 = inlined_call_operand.vmem [shape: f32[1,256], index: 2, kind: input, shape index: {}]   ;;  %s678_s3 = inlined_call_operand.vmem [shape: f32[1,256], index: 3, kind: input, shape index: {}]   ;;  %s679_s4 = inlined_call_operand.hbm [shape: bf16[8,256], index: 4, kind: output, shape index: {}]  }
   0x1   :  { %10 = vsyncpa [#allocation6], 0 }
   0x2   :  { %11 = vsyncpa [#allocation4], 0  ;;  %s588_s15 = smov [#allocation2]   ;;  %s589_s17 = smov [#allocation5]  }
   0x3   :  { %s18_s16 = sshll.u32 %s588_s15, 4  ;;  %s27_s18 = sshll.u32 %s589_s17, 4  ;;  %s19_s16 = int_to_ptr.vmem [resolvable:$true] %s18_s16  ;;  %s619_s18 = int_to_ptr.vmem [resolvable:$true] %s27_s18 }
   0x4   :  { %s516_s21 = scalar_lea.hbm %s675_s0, 128 }
   0x5   :  { %p517_p0 = scmp.ne.s32.totalorder %s675_s0, %s516_s21  ;;  %p520_p1 = scmp.lt.u32.totalorder %s516_s21, %s675_s0 }
   0x7   :  { %p522_p2 = pnand %p520_p1, %p517_p0 }
   0x9   :  { %525 = shalt.err (!%p522_p2)
}
   0xa   :  { %s526_s26 = scalar_lea.vmem %s19_s16, 128  ;;  %p531_p4 = scmp.lt.s32.totalorder %s19_s16, %s19_s16 }
   0xb   :  { %p527_p3 = scmp.ne.s32.totalorder %s19_s16, %s526_s26  ;;  %p532_p5 = scmp.lt.s32.totalorder %s526_s26, %s526_s26 }
   0xd   :  { %p533_p6 = por %p532_p5, %p531_p4 }
   0xf   :  { %p534_p7 = pnand %p533_p6, %p527_p3 }
  0x11   :  { %537 = shalt.err (!%p534_p7)
}
  0x12   :  { %21 = dma.hbm_to_vmem [thread:$0]  %s675_s0, 128, %s19_s16, [#allocation3]  }
  0x13   :  { %s538_s5 = scalar_lea.hbm %s676_s1, 4096 }
  0x14   :  { %p539_p8 = scmp.ne.s32.totalorder %s676_s1, %s538_s5  ;;  %p542_p9 = scmp.lt.u32.totalorder %s538_s5, %s676_s1 }
  0x16   :  { %p544_p10 = pnand %p542_p9, %p539_p8 }
  0x18   :  { %547 = shalt.err (!%p544_p10)
}
  0x19   :  { %s548_s10 = scalar_lea.vmem %s619_s18, 4096  ;;  %p553_p12 = scmp.lt.s32.totalorder %s619_s18, %s619_s18 }
  0x1a   :  { %p549_p11 = scmp.ne.s32.totalorder %s619_s18, %s548_s10  ;;  %p554_p13 = scmp.lt.s32.totalorder %s548_s10, %s548_s10 }
  0x1c   :  { %p555_p0 = por %p554_p13, %p553_p12 }
  0x1e   :  { %p556_p1 = pnand %p555_p0, %p549_p11 }
  0x20   :  { %559 = shalt.err (!%p556_p1)
}
  0x21   :  { %s590_s0 = smov 128   ;;  %s591_s11 = smov 8  }
  0x22   :  { %33 = dma.hbm_to_vmem [thread:$0]  %s676_s1, 4096, %s619_s18, [#allocation6], %s590_s0, %s590_s0, %s591_s11  }
  0x23   :  { %582 = dma.done.wait [#allocation3], 128  }
  0x24   :  { %583 = vsyncadd [#allocation3], 4294967168 }
  0x25   :  { %584 = dma.done.wait [#allocation6], 4096  }
  0x26   :  { %585 = vsyncadd [#allocation6], 4294963200  ;;  %v462_v0 = vld [vmem:[#allocation5 + $0x4] ss:$8 sps:$4 sm:$0xff]   ;;  %v464_v1 = vld [vmem:[#allocation5] ss:$8 sps:$4 sm:$0xff]  }
  0x27   :  { %244 = vmatprep.subr.bf16.mxu0 %v462_v0  ;;  %v465_v2 = vld [vmem:[#allocation5 + $0x14] ss:$8 sps:$4 sm:$0xff]   ;;  %v467_v3 = vld [vmem:[#allocation5 + $0x10] ss:$8 sps:$4 sm:$0xff]   ;;  %v468_v4 = vld [vmem:[#allocation5 + $0x24] ss:$8 sps:$4 sm:$0xff]  }
  0x28   :  { %245 = vmatpush1.bf16.msra.mxu0 %v464_v1  ;;  %v470_v5 = vld [vmem:[#allocation5 + $0x20] ss:$8 sps:$4 sm:$0xff]   ;;  %v471_v6 = vld [vmem:[#allocation5 + $0x34] ss:$8 sps:$4 sm:$0xff]   ;;  %v473_v7 = vld [vmem:[#allocation5 + $0x30] ss:$8 sps:$4 sm:$0xff]  }
  0x29   :  { %246 = vmatprep.subr.bf16.mxu0 %v465_v2  ;;  %v474_v8 = vld [vmem:[#allocation5 + $0x44] ss:$8 sps:$4 sm:$0xff]   ;;  %v476_v9 = vld [vmem:[#allocation5 + $0x40] ss:$8 sps:$4 sm:$0xff]   ;;  %v477_v10 = vld [vmem:[#allocation5 + $0x54] ss:$8 sps:$4 sm:$0xff]  }
  0x2a   :  { %v479_v11 = vld [vmem:[#allocation5 + $0x50] ss:$8 sps:$4 sm:$0xff]   ;;  %v480_v12 = vld [vmem:[#allocation5 + $0x64] ss:$8 sps:$4 sm:$0xff]   ;;  %v482_v15 = vld [vmem:[#allocation5 + $0x60] ss:$8 sps:$4 sm:$0xff]  }
  0x2b   :  { %v44_v13 = vld [vmem:[#allocation2] sm:$0xff]  ;;  %v486_v18 = vld [vmem:[#allocation5 + $0x84] ss:$8 sps:$4 sm:$0xff]   ;;  %v488_v19 = vld [vmem:[#allocation5 + $0x80] ss:$8 sps:$4 sm:$0xff]  }
  0x2c   :  { %247 = vmatpush1.bf16.msra.mxu0 %v467_v3  ;;  %v421_v14 = vcombine.high %v44_v13, %v44_v13  ;;  %v483_v16 = vld [vmem:[#allocation5 + $0x74] ss:$8 sps:$4 sm:$0xff]   ;;  %v485_v17 = vld [vmem:[#allocation5 + $0x70] ss:$8 sps:$4 sm:$0xff]   ;;  %v492_v22 = vld [vmem:[#allocation5 + $0xa4] ss:$8 sps:$4 sm:$0xff]   ;;  %v420_v34 = vcombine.low %v44_v13, %v44_v13 }
  0x2d   :  { %248 = vmatprep.subr.bf16.mxu0 %v468_v4  ;;  %v489_v20 = vld [vmem:[#allocation5 + $0x94] ss:$8 sps:$4 sm:$0xff]   ;;  %v491_v21 = vld [vmem:[#allocation5 + $0x90] ss:$8 sps:$4 sm:$0xff]   ;;  %v494_v23 = vld [vmem:[#allocation5 + $0xa0] ss:$8 sps:$4 sm:$0xff]  }
  0x2e   :  { %276 = vmatprep.mubr.bf16.mxu0 %v421_v14  ;;  %v495_v24 = vld [vmem:[#allocation5 + $0xb4] ss:$8 sps:$4 sm:$0xff]   ;;  %v497_v25 = vld [vmem:[#allocation5 + $0xb0] ss:$8 sps:$4 sm:$0xff]   ;;  %v498_v26 = vld [vmem:[#allocation5 + $0xc4] ss:$8 sps:$4 sm:$0xff]  }
  0x2f   :  { %v500_v27 = vld [vmem:[#allocation5 + $0xc0] ss:$8 sps:$4 sm:$0xff]   ;;  %v501_v28 = vld [vmem:[#allocation5 + $0xd4] ss:$8 sps:$4 sm:$0xff]   ;;  %v503_v29 = vld [vmem:[#allocation5 + $0xd0] ss:$8 sps:$4 sm:$0xff]  }
  0x30   :  { %249 = vmatpush1.bf16.msra.mxu0 %v470_v5  ;;  %v504_v30 = vld [vmem:[#allocation5 + $0xe4] ss:$8 sps:$4 sm:$0xff]   ;;  %v506_v31 = vld [vmem:[#allocation5 + $0xe0] ss:$8 sps:$4 sm:$0xff]   ;;  %v507_v32 = vld [vmem:[#allocation5 + $0xf4] ss:$8 sps:$4 sm:$0xff]  }
  0x31   :  { %250 = vmatprep.subr.bf16.mxu0 %v471_v6  ;;  %v509_v33 = vld [vmem:[#allocation5 + $0xf0] ss:$8 sps:$4 sm:$0xff]   ;;  %v592_v13 = vmov 1966171168  }
  0x32   :  { %v330_v14 = vunpack.c.l.s4 %v592_v13 }
  0x34   :  { %251 = vmatpush1.bf16.msra.mxu0 %v473_v7 }
  0x35   :  { %252 = vmatprep.subr.bf16.mxu0 %v474_v8 }
  0x38   :  { %253 = vmatpush1.bf16.msra.mxu0 %v476_v9 }
  0x39   :  { %254 = vmatprep.subr.bf16.mxu0 %v477_v10 }
  0x3c   :  { %255 = vmatpush1.bf16.msra.mxu0 %v479_v11 }
  0x3d   :  { %256 = vmatprep.subr.bf16.mxu0 %v480_v12 }
  0x40   :  { %257 = vmatpush1.bf16.msra.mxu0 %v482_v15  ;;  %v332_v15 = vlaneseq }
  0x41   :  { %258 = vmatprep.subr.bf16.mxu0 %v483_v16  ;;  %v331_v16 = vunpack.c.0.s8 %v330_v14 }
  0x44   :  { %259 = vmatpush1.bf16.msra.mxu0 %v485_v17  ;;  %v333_v17 = vshrl.u32 %v332_v15, 7 }
  0x45   :  { %260 = vmatprep.subr.bf16.mxu0 %v486_v18 }
  0x48   :  { %261 = vmatpush1.bf16.msra.mxu0 %v488_v19  ;;  %v334_v19 = vsub.s32 %v331_v16, %v333_v17 }
  0x49   :  { %262 = vmatprep.subr.bf16.mxu0 %v489_v20 }
  0x4c   :  { %263 = vmatpush1.bf16.msra.mxu0 %v491_v21 }
  0x4d   :  { %264 = vmatprep.subr.bf16.mxu0 %v492_v22 }
  0x50   :  { %265 = vmatpush1.bf16.msra.mxu0 %v494_v23  ;;  %v321_v23 = vld [vmem:[%s677_s2] sm:$0x3]  ;;  %s593_s2 = smov [#allocation7]  }
  0x51   :  { %266 = vmatprep.subr.bf16.mxu0 %v495_v24  ;;  %s410_s17 = sshll.u32 %s593_s2, 4  ;;  %s411_s17 = int_to_ptr.vmem [resolvable:$true] %s410_s17 }
  0x52   :  { %s560_s18 = scalar_lea.vmem %s411_s17, 128  ;;  %p565_p3 = scmp.lt.s32.totalorder %s411_s17, %s411_s17 }
  0x53   :  { %p561_p2 = scmp.ne.s32.totalorder %s411_s17, %s560_s18  ;;  %p566_p4 = scmp.lt.s32.totalorder %s560_s18, %s560_s18 }
  0x54   :  { %267 = vmatpush1.bf16.msra.mxu0 %v497_v25  ;;  %v353_v25 = vsub.s32 1, %v333_v17 }
  0x55   :  { %268 = vmatprep.subr.bf16.mxu0 %v498_v26  ;;  %v349_v26 = vsub.s32 0, %v333_v17  ;;  %p567_p5 = por %p566_p4, %p565_p3 }
  0x57   :  { %p568_p6 = pnand %p567_p5, %p561_p2 }
  0x58   :  { %269 = vmatpush1.bf16.msra.mxu0 %v500_v27 }
  0x59   :  { %270 = vmatprep.subr.bf16.mxu0 %v501_v28 }
  0x5c   :  { %271 = vmatpush1.bf16.msra.mxu0 %v503_v29 }
  0x5d   :  { %272 = vmatprep.subr.bf16.mxu0 %v504_v30 }
  0x60   :  { %273 = vmatpush1.bf16.msra.mxu0 %v506_v31 }
  0x61   :  { %274 = vmatprep.subr.bf16.mxu0 %v507_v32 }
  0x64   :  { %275 = vmatpush1.bf16.msra.mxu0 %v509_v33 }
  0x67   :  { %277 = vmatmul.mubr.bf16.vlgmr.msra.gmra.mrb[0].mxu0 %v420_v34 }
 0x13a   :  { %v650_v35 = vpop.f32.mrb[0].mxu0 }
 0x13b   :  { %v285_v36 = vrot.slane %v650_v35, 4  ;;  %v299_v37 = vmul.f32 %v650_v35, %v650_v35  ;;  %v280_v38 = vpop.f32.mrb[1].mxu0 }
 0x13c   :  { %v291_v39 = vrot.slane %v280_v38, 4  ;;  %v300_v40 = vmul.f32 %v280_v38, %v280_v38  ;;  %v282_v41 = vpop.f32.mrb[2].mxu0 }
 0x13d   :  { %v286_v42 = vadd.f32 %v285_v36, %v650_v35  ;;  %v301_v43 = vrot.slane %v299_v37, 4  ;;  %v283_v44 = vpop.f32.mrb[3].mxu0 }
 0x13e   :  { %v292_v45 = vadd.f32 %v291_v39, %v280_v38  ;;  %v307_v46 = vrot.slane %v300_v40, 4 }
 0x13f   :  { %v287_v47 = vrot.slane %v286_v42, 2  ;;  %v302_v48 = vadd.f32 %v301_v43, %v299_v37  ;;  %v345_v37 = vld [vmem:[%s678_s3] sm:$0x3] }
 0x140   :  { %v293_v49 = vrot.slane %v292_v45, 2  ;;  %v308_v50 = vadd.f32 %v307_v46, %v300_v40 }
 0x141   :  { %v288_v51 = vadd.f32 %v287_v47, %v286_v42  ;;  %v303_v52 = vrot.slane %v302_v48, 2 }
 0x142   :  { %v294_v53 = vadd.f32 %v293_v49, %v292_v45  ;;  %v309_v54 = vrot.slane %v308_v50, 2 }
 0x143   :  { %v289_v55 = vrot.slane %v288_v51, 1  ;;  %v304_v56 = vadd.f32 %v303_v52, %v302_v48 }
 0x144   :  { %v295_v57 = vrot.slane %v294_v53, 1  ;;  %v310_v58 = vadd.f32 %v309_v54, %v308_v50 }
 0x145   :  { %v290_v59 = vadd.f32 %v289_v55, %v288_v51  ;;  %v305_v60 = vrot.slane %v304_v56, 1 }
 0x146   :  { %v296_v61 = vadd.f32 %v295_v57, %v294_v53  ;;  %v311_v62 = vrot.slane %v310_v58, 1 }
 0x147   :  { %v297_v63 = vmul.f32 0.125, %v290_v59  ;;  %v306_v0 = vadd.f32 %v305_v60, %v304_v56 }
 0x148   :  { %v298_v1 = vmul.f32 0.125, %v296_v61  ;;  %v312_v2 = vadd.f32 %v311_v62, %v310_v58 }
 0x149   :  { %v313_v3 = vmul.f32 0.125, %v306_v0  ;;  %v315_v4 = vmul.f32 %v297_v63, %v297_v63 }
 0x14a   :  { %v314_v5 = vmul.f32 0.125, %v312_v2  ;;  %v316_v6 = vmul.f32 %v298_v1, %v298_v1 }
 0x14b   :  { %v317_v7 = vsub.f32 %v313_v3, %v315_v4 }
 0x14c   :  { %v318_v8 = vsub.f32 %v314_v5, %v316_v6 }
 0x14d   :  { %v319_v9 = vmax.f32 %v317_v7, 0.0 }
 0x14e   :  { %v320_v10 = vmax.f32 %v318_v8, 0.0 }
 0x14f   :  { %v322_v11 = vadd.f32 1e-05, %v319_v9 }
 0x150   :  { %v323_v12 = vadd.f32 1e-05, %v320_v10 }
 0x151   :  { %512 = vrsqrt.f32 %v322_v11 }
 0x152   :  { %514 = vrsqrt.f32 %v323_v12 }
 0x15b   :  { %v513_v18 = vpop.eup %512 }
 0x15c   :  { %v515_v20 = vpop.eup %514 }
 0x15d   :  { %v328_v21 = vcombine.low %v513_v18, %v515_v20 }
 0x15f   :  { %v335_v22 = vrot.slane %v328_v21, %v334_v19 }
 0x161   :  { %v342_v24 = vrot.slane %v335_v22, %v334_v19 }
 0x163   :  { %v344_v27 = vmul.f32 %v342_v24, %v321_v23 }
 0x165   :  { %v354_v28 = vrot.slane %v344_v27, %v353_v25  ;;  %v350_v29 = vrot.slane %v344_v27, %v349_v26 }
 0x167   :  { %v358_v30 = vmul.f32 %v354_v28, %v298_v1  ;;  %v379_v31 = vmul.f32 %v354_v28, %v280_v38  ;;  %v357_v32 = vmul.f32 %v350_v29, %v297_v63  ;;  %v378_v33 = vmul.f32 %v350_v29, %v650_v35 }
 0x169   :  { %v361_v34 = vcombine.low %v357_v32, %v358_v30 }
 0x16b   :  { %v368_v36 = vrot.slane %v361_v34, %v334_v19 }
 0x16d   :  { %v375_v39 = vrot.slane %v368_v36, %v334_v19 }
 0x16f   :  { %v377_v40 = vsub.f32 %v345_v37, %v375_v39 }
 0x171   :  { %v384_v41 = vrot.slane %v377_v40, %v349_v26  ;;  %v388_v42 = vrot.slane %v377_v40, %v353_v25 }
 0x173   :  { %v391_v43 = vadd.f32 %v384_v41, %v378_v33  ;;  %v392_v44 = vadd.f32 %v388_v42, %v379_v31 }
 0x175   :  { %v393_v45 = vmax.f32 %v391_v43, 0.0  ;;  %v394_v46 = vmax.f32 %v392_v44, 0.0 }
 0x177   :  { %v455_v38 = vpack.c.bf16 %v394_v46, %v393_v45 }
 0x179   :  { %403 = vst [vmem:[#allocation7] sm:$0xff] %v455_v38 }
 0x17a   :  { %571 = shalt.err (!%p568_p6)
}
 0x17b   :  { %s572_s20 = scalar_lea.hbm %s679_s4, 128 }
 0x17c   :  { %p573_p7 = scmp.ne.s32.totalorder %s679_s4, %s572_s20  ;;  %p576_p8 = scmp.lt.u32.totalorder %s572_s20, %s679_s4 }
 0x17e   :  { %p578_p9 = pnand %p576_p8, %p573_p7 }
 0x180   :  { %581 = shalt.err (!%p578_p9)
}
 0x181   :  { %413 = dma.vmem_to_hbm [thread:$0]  %s411_s17, 128, %s679_s4, [#allocation4]  }
 0x182   :  { %586 = dma.done.wait [#allocation4], 128  }
 0x183   :  { %587 = vsyncadd [#allocation4], 4294967168 }
 0x184   :  { %417 = vsyncpa [#allocation3], 1 }
 0x185   :  { %418 = vsyncpa [#allocation6], 1 }
 0x186   :  { %419 = vsyncpa [#allocation4], 1 }

</bundles_post_ra>
